<compile_context>
chip_gen: v7x
topology: tpu7x:2x2x1
jax: 0.10.0
libtpu: 0.0.40
codegen_flags: <defaults>
</compile_context>

<pallas_src>
import jax
import jax.numpy as jnp
from jax import lax
from jax.experimental import pallas as pl
from jax.experimental.pallas import tpu as pltpu


_STATIC_UNROLL_MAX = 16   # fully unroll the time loop up to this chunk length


def _make_indrnn_kernel(num_layers, time_chunk, batch, hidden, activation, has_rest):
    L, Tc, B, H = num_layers, time_chunk, batch, hidden
    act = jnp.tanh if activation == "tanh" else (lambda v: jnp.maximum(v, 0.0))

    def body(x_ref, w0_ref, wr_ref, b_ref, u_ref, o_ref, h_ref, work_ref):
        # Zero every layer's hidden state at the start of the sequence.
        @pl.when(pl.program_id(0) == 0)
        def _():
            h_ref[...] = jnp.zeros_like(h_ref)

        a = x_ref[...]                               # (Tc*B, C_in), projection dtype
        for l in range(L):                           # static unroll over layers
            w = w0_ref[...] if l == 0 else wr_ref[l - 1]
            # Chunk-wide input projection (+ bias): one MXU matmul per (chunk, layer),
            # off the serial recurrence path.  Accumulate in f32.
            proj = jnp.dot(a, w, preferred_element_type=jnp.float32) + b_ref[l]
            # Stage into the work slab so every per-step access is a whole
            # leading-axis tile (no sub-sublane slicing inside the serial loop).
            work_ref[...] = proj.reshape(Tc, B, H)
            # Hoist the (1, H) -> (B, H) broadcast out of the time loop.
            u_b = jnp.broadcast_to(u_ref[l], (B, H))

            def step(t, h):
                h = act(work_ref[t] + u_b * h)       # pure VPU mul->add->max chain
                work_ref[t] = h                      # becomes next layer's input
                return h

            if Tc <= _STATIC_UNROLL_MAX:
                h = h_ref[l]
                for t in range(Tc):                  # static indices; live set ~1 vreg
                    h = step(t, h)
                h_ref[l] = h
            else:
                # Long chunks: bounded code size / live ranges, partial unroll.
                h_ref[l] = lax.fori_loop(0, Tc, step, h_ref[l], unroll=8)

            if l + 1 < L:
                a = work_ref[...].reshape(Tc * B, H).astype(a.dtype)

        # Single sublane/lane-dense store of the whole chunk (last layer only).
        o_ref[...] = work_ref[...].reshape(Tc * B, H).astype(o_ref.dtype)

    if has_rest:
        def kernel(x_ref, w0_ref, wr_ref, b_ref, u_ref, o_ref, h_ref, work_ref):
            body(x_ref, w0_ref, wr_ref, b_ref, u_ref, o_ref, h_ref, work_ref)
    else:
        def kernel(x_ref, w0_ref, b_ref, u_ref, o_ref, h_ref, work_ref):
            body(x_ref, w0_ref, None, b_ref, u_ref, o_ref, h_ref, work_ref)
    return kernel


def _ceil_to(n, m):
    return ((n + m - 1) // m) * m


def _vmem_estimate(Tc, B, C, H, L, proj_bytes):
    """Rough VMEM footprint (bytes), including (8,128) tile padding and the
    double-buffering the pipeline applies to every pallas_call operand."""
    def tile2d(rows, cols, nbytes):
        return _ceil_to(max(rows, 1), 8) * _ceil_to(max(cols, 1), 128) * nbytes

    rows = Tc * B
    x_blk = tile2d(rows, C, proj_bytes)
    o_blk = tile2d(rows, H, 4)
    w_blk = tile2d(C, H, proj_bytes) + max(L - 1, 0) * tile2d(H, H, proj_bytes)
    small = 2 * L * tile2d(1, H, 4)                        # bias + u
    scratch = L * tile2d(B, H, 4) + Tc * tile2d(B, H, 4)   # hidden state + work slab
    return 2 * (x_blk + o_blk + w_blk + small) + scratch


def _pick_time_chunk(T, B, C, H, L, proj_bytes, vmem_budget=24 << 20, max_rows=4096):
    """Largest Tc dividing T such that the (Tc*B)-row blocks satisfy the TPU (8,128)
    sublane rule and the kernel fits a conservative (v7x 64 MiB) VMEM budget; the row
    count is softly capped to keep per-chunk matmuls / work slabs reasonable."""
    cands = [d for d in range(T, 0, -1)
             if T % d == 0 and ((d * B) % 8 == 0 or d == T)]
    for tc in cands:
        if tc * B <= max_rows and _vmem_estimate(tc, B, C, H, L, proj_bytes) <= vmem_budget:
            return tc
    for tc in cands:
        if _vmem_estimate(tc, B, C, H, L, proj_bytes) <= vmem_budget:
            return tc
    return cands[-1]


def indrnn_forward(x, layer_params, time_chunk=None, activation="relu",
                   proj_dtype=jnp.float32):
    """x: (T, B, input_size) time-major float.
    layer_params: list of (w_t(C_in, H), bias(H,), u(H,)) per layer, with w_t the
    transpose of PyTorch's weight_ih so the in-kernel projection is x @ w_t.
    proj_dtype: dtype for x / W_ih on the MXU (bf16 recommended on v6e/v7x); the
    recurrence state, bias and u stay f32."""
    T, B, C = x.shape
    L = len(layer_params)
    H = layer_params[0][0].shape[1]
    proj_dtype = jnp.dtype(proj_dtype)
    pb = proj_dtype.itemsize

    Tc = _pick_time_chunk(T, B, C, H, L, pb) if time_chunk is None else int(time_chunk)
    if T % Tc != 0:
        raise ValueError(f"time_chunk={Tc} must divide T={T}")
    if (Tc * B) % 8 != 0 and Tc != T:
        raise ValueError(f"time_chunk={Tc}: Tc*B={Tc * B} must be a multiple of 8 "
                         "(TPU sublane rule) unless Tc == T")
    TB = Tc * B

    # Present I/O as lane/sublane-dense 2-D slabs (layout plumbing only).
    x2 = x.reshape(T * B, C).astype(proj_dtype)
    w0 = layer_params[0][0].astype(proj_dtype)                                  # (C, H)
    b = jnp.stack([p[1] for p in layer_params]).reshape(L, 1, H).astype(jnp.float32)
    u = jnp.stack([p[2] for p in layer_params]).reshape(L, 1, H).astype(jnp.float32)

    operands = [x2, w0]
    in_specs = [
        pl.BlockSpec((TB, C), lambda c: (c, 0)),        # x, chunked over time rows
        pl.BlockSpec((C, H), lambda c: (0, 0)),         # layer-0 weight (transposed)
    ]
    if L > 1:
        w_rest = jnp.stack([p[0] for p in layer_params[1:]]).astype(proj_dtype)  # (L-1, H, H)
        operands.append(w_rest)
        in_specs.append(pl.BlockSpec((L - 1, H, H), lambda c: (0, 0, 0)))
    operands += [b, u]
    in_specs += [
        pl.BlockSpec((L, 1, H), lambda c: (0, 0, 0)),   # biases
        pl.BlockSpec((L, 1, H), lambda c: (0, 0, 0)),   # recurrent weights u
    ]

    est = _vmem_estimate(Tc, B, C, H, L, pb)
    vmem_limit = int(min(64 << 20, max(2 * est + (1 << 20), 32 << 20)))

    kernel = _make_indrnn_kernel(L, Tc, B, H, activation, has_rest=(L > 1))
    out2 = pl.pallas_call(
        kernel,
        out_shape=jax.ShapeDtypeStruct((T * B, H), jnp.float32),
        grid_spec=pltpu.PrefetchScalarGridSpec(
            num_scalar_prefetch=0,
            grid=(T // Tc,),
            in_specs=in_specs,
            out_specs=pl.BlockSpec((TB, H), lambda c: (c, 0)),
            scratch_shapes=[
                pltpu.VMEM((L, B, H), jnp.float32),     # per-layer carried hidden state
                pltpu.VMEM((Tc, B, H), jnp.float32),    # proj / activation work slab
            ],
        ),
        compiler_params=pltpu.CompilerParams(
            # Time recurrence -> the (chunked) grid axis must run sequentially.
            dimension_semantics=("arbitrary",),
            vmem_limit_bytes=vmem_limit,
        ),
    )(*operands)

    out = out2.reshape(T, B, H)
    if H == 1:   # PyTorch: `.squeeze(2)` only drops the dim when it is 1.
        out = jnp.squeeze(out, axis=2)
    return out


def make_params(key, input_size, hidden_size, num_layers):
    """Deterministic init matching IndRNNCell defaults:
       weight_ih ~ N(0, 0.01), weight_hh = 1, bias_ih = 0.
       recurrent_min_abs/max_abs default to None -> clip_recurrent_weights is a no-op."""
    params = []
    c_in = input_size
    for _ in range(num_layers):
        key, sub = jax.random.split(key)
        # PyTorch weight_ih is (H, C_in); we store its transpose (C_in, H).
        w_t = 0.01 * jax.random.normal(sub, (c_in, hidden_size), dtype=jnp.float32)
        bias = jnp.zeros((hidden_size,), dtype=jnp.float32)
        u = jnp.ones((hidden_size,), dtype=jnp.float32)
        params.append((w_t, bias, u))
        c_in = hidden_size
    return params


def indrnn_reference(x, layer_params, activation="relu"):
    """Pure-JAX (f32) reference for validation."""
    act = jnp.tanh if activation == "tanh" else jax.nn.relu
    out = x
    for (w_t, bias, u) in layer_params:
        T, B, _ = out.shape
        H = w_t.shape[1]
        h = jnp.zeros((B, H), dtype=jnp.float32)
        ys = []
        for t in range(T):
            h = act(out[t] @ w_t + bias + u * h)
            ys.append(h)
        out = jnp.stack(ys, axis=0)
    if out.shape[2] == 1:
        out = jnp.squeeze(out, axis=2)
    return out


if __name__ == "__main__":
    # Small shapes consistent with the module: seq=8, batch=2, input=4, hidden=32, 2 layers.
    T, B, INPUT, HIDDEN, LAYERS = 8, 2, 4, 32, 2

    key = jax.random.PRNGKey(0)
    key, kx = jax.random.split(key)
    x = jax.random.normal(kx, (T, B, INPUT), dtype=jnp.float32)   # time-major (T, B, C)

    params = make_params(key, INPUT, HIDDEN, LAYERS)
    ref = indrnn_reference(x, params)

    # Default configuration (auto-picked chunk, f32 projections).
    out = jax.block_until_ready(indrnn_forward(x, params))
    assert out.shape == (T, B, HIDDEN), out.shape
    assert jnp.allclose(out, ref, rtol=1e-5, atol=1e-5), "mismatch vs reference (auto chunk)"

    # Chunked run (Tc=4 -> grid=(2,)) exercising the hidden-state carry across chunks.
    out_c = jax.block_until_ready(indrnn_forward(x, params, time_chunk=4))
    assert jnp.allclose(out_c, ref, rtol=1e-5, atol=1e-5), "mismatch vs reference (chunked)"

    # bf16 projections (MXU fast path); recurrence state stays f32 -> looser tolerance.
    out_bf = jax.block_until_ready(
        indrnn_forward(x, params, time_chunk=4, proj_dtype=jnp.bfloat16))
    assert jnp.allclose(out_bf, ref, rtol=2e-2, atol=2e-2), "mismatch vs reference (bf16 proj)"

    # Single-layer path (no w_rest operand / DMA at all).
    params1 = make_params(jax.random.PRNGKey(1), INPUT, HIDDEN, 1)
    ref1 = indrnn_reference(x, params1)
    out1 = jax.block_until_ready(indrnn_forward(x, params1))
    assert jnp.allclose(out1, ref1, rtol=1e-5, atol=1e-5), "mismatch vs reference (1 layer)"

    print("KERNEL_OK")
</pallas_src>

<mosaic_0001>
module attributes {stable_mosaic.version = 11 : i64} {
  func.func @kernel(%arg0: i32, %arg1: memref<16x4xf32, #tpu.memory_space<vmem>>, %arg2: memref<4x32xf32, #tpu.memory_space<vmem>>, %arg3: memref<1x32x32xf32, #tpu.memory_space<vmem>>, %arg4: memref<2x1x32xf32, #tpu.memory_space<vmem>>, %arg5: memref<2x1x32xf32, #tpu.memory_space<vmem>>, %arg6: memref<16x32xf32, #tpu.memory_space<vmem>>, %arg7: memref<2x2x32xf32, #tpu.memory_space<vmem>>, %arg8: memref<8x2x32xf32, #tpu.memory_space<vmem>>) attributes {dimension_semantics = [#tpu.dimension_semantics<arbitrary>], iteration_bounds = array<i64: 1>, scalar_prefetch = 0 : i64, scratch_operands = 2 : i64, tpu.core_type = #tpu.core_type<tc>, window_params = [{transform_indices = @transform_0, window_bounds = array<i64: 16, 4>}, {pipeline_mode = #tpu.pipeline_mode<synchronous>, transform_indices = @transform_1, window_bounds = array<i64: 4, 32>}, {pipeline_mode = #tpu.pipeline_mode<synchronous>, transform_indices = @transform_2, window_bounds = array<i64: 1, 32, 32>}, {pipeline_mode = #tpu.pipeline_mode<synchronous>, transform_indices = @transform_3, window_bounds = array<i64: 2, 1, 32>}, {pipeline_mode = #tpu.pipeline_mode<synchronous>, transform_indices = @transform_4, window_bounds = array<i64: 2, 1, 32>}, {transform_indices = @transform_5, window_bounds = array<i64: 16, 32>}]} {
    %c0_i32 = arith.constant 0 : i32
    %0 = arith.cmpi eq, %arg0, %c0_i32 : i32
    %1 = arith.extui %0 : i1 to i32
    %c0_i32_0 = arith.constant 0 : i32
    %2 = arith.cmpi ne, %1, %c0_i32_0 : i32
    scf.if %2 {
      %cst_151 = arith.constant 0.000000e+00 : f32
      %188 = vector.broadcast %cst_151 : f32 to vector<2x2x32xf32>
      %c0_152 = arith.constant 0 : index
      %c0_153 = arith.constant 0 : index
      %c0_154 = arith.constant 0 : index
      %189 = vector.load %arg7[%c0_152, %c0_153, %c0_154] : memref<2x2x32xf32, #tpu.memory_space<vmem>>, vector<2x2x32xf32>
      tpu.vector_store %arg7[%c0_152, %c0_153, %c0_154], %188 {strides = array<i32>} : memref<2x2x32xf32, #tpu.memory_space<vmem>>, vector<2x2x32xf32>,
    } else {
    }
    %c0 = arith.constant 0 : index
    %c0_1 = arith.constant 0 : index
    %3 = vector.load %arg1[%c0, %c0_1] : memref<16x4xf32, #tpu.memory_space<vmem>>, vector<16x4xf32>
    %c0_2 = arith.constant 0 : index
    %c0_3 = arith.constant 0 : index
    %4 = vector.load %arg2[%c0_2, %c0_3] : memref<4x32xf32, #tpu.memory_space<vmem>>, vector<4x32xf32>
    %cst = arith.constant dense<0.000000e+00> : vector<16x32xf32>
    %5 = tpu.matmul %3, %4, %cst {dimension_numbers = #tpu.dot_dimension_numbers<[1], [0], [0], [1], [0, 0, 1, 1], [], []>} : vector<16x4xf32>, vector<4x32xf32>, vector<16x32xf32> -> vector<16x32xf32>
    %c0_4 = arith.constant 0 : index
    %c0_5 = arith.constant 0 : index
    %c0_6 = arith.constant 0 : index
    %6 = vector.load %arg4[%c0_4, %c0_5, %c0_6] : memref<2x1x32xf32, #tpu.memory_space<vmem>>, vector<1x1x32xf32>
    %7 = vector.shape_cast %6 : vector<1x1x32xf32> to vector<1x32xf32>
    %8 = vector.broadcast %7 : vector<1x32xf32> to vector<16x32xf32>
    %9 = arith.addf %5, %8 : vector<16x32xf32>
    %10 = vector.shape_cast %9 : vector<16x32xf32> to vector<8x2x32xf32>
    %c0_7 = arith.constant 0 : index
    %c0_8 = arith.constant 0 : index
    %c0_9 = arith.constant 0 : index
    %11 = vector.load %arg8[%c0_7, %c0_8, %c0_9] : memref<8x2x32xf32, #tpu.memory_space<vmem>>, vector<8x2x32xf32>
    tpu.vector_store %arg8[%c0_7, %c0_8, %c0_9], %10 {strides = array<i32>} : memref<8x2x32xf32, #tpu.memory_space<vmem>>, vector<8x2x32xf32>,
    %c0_10 = arith.constant 0 : index
    %c0_11 = arith.constant 0 : index
    %c0_12 = arith.constant 0 : index
    %12 = vector.load %arg5[%c0_10, %c0_11, %c0_12] : memref<2x1x32xf32, #tpu.memory_space<vmem>>, vector<1x1x32xf32>
    %13 = vector.shape_cast %12 : vector<1x1x32xf32> to vector<1x32xf32>
    %14 = vector.shape_cast %13 : vector<1x32xf32> to vector<1x32xf32>
    %15 = vector.broadcast %14 : vector<1x32xf32> to vector<2x32xf32>
    %c0_13 = arith.constant 0 : index
    %c0_14 = arith.constant 0 : index
    %c0_15 = arith.constant 0 : index
    %16 = vector.load %arg7[%c0_13, %c0_14, %c0_15] : memref<2x2x32xf32, #tpu.memory_space<vmem>>, vector<1x2x32xf32>
    %17 = vector.shape_cast %16 : vector<1x2x32xf32> to vector<2x32xf32>
    %c0_16 = arith.constant 0 : index
    %c0_17 = arith.constant 0 : index
    %c0_18 = arith.constant 0 : index
    %18 = vector.load %arg8[%c0_16, %c0_17, %c0_18] : memref<8x2x32xf32, #tpu.memory_space<vmem>>, vector<1x2x32xf32>
    %19 = vector.shape_cast %18 : vector<1x2x32xf32> to vector<2x32xf32>
    %20 = arith.mulf %15, %17 : vector<2x32xf32>
    %21 = arith.addf %19, %20 : vector<2x32xf32>
    %cst_19 = arith.constant 0.000000e+00 : f32
    %22 = vector.broadcast %cst_19 : f32 to vector<2x32xf32>
    %23 = arith.maximumf %21, %22 : vector<2x32xf32>
    %c0_20 = arith.constant 0 : index
    %c0_21 = arith.constant 0 : index
    %c0_22 = arith.constant 0 : index
    %24 = vector.load %arg8[%c0_20, %c0_21, %c0_22] : memref<8x2x32xf32, #tpu.memory_space<vmem>>, vector<1x2x32xf32>
    %25 = vector.shape_cast %24 : vector<1x2x32xf32> to vector<2x32xf32>
    %26 = vector.shape_cast %23 : vector<2x32xf32> to vector<1x2x32xf32>
    tpu.vector_store %arg8[%c0_20, %c0_21, %c0_22], %26 {strides = array<i32>} : memref<8x2x32xf32, #tpu.memory_space<vmem>>, vector<1x2x32xf32>,
    %c1 = arith.constant 1 : index
    %c0_23 = arith.constant 0 : index
    %c0_24 = arith.constant 0 : index
    %27 = vector.load %arg8[%c1, %c0_23, %c0_24] : memref<8x2x32xf32, #tpu.memory_space<vmem>>, vector<1x2x32xf32>
    %28 = vector.shape_cast %27 : vector<1x2x32xf32> to vector<2x32xf32>
    %29 = arith.mulf %15, %23 : vector<2x32xf32>
    %30 = arith.addf %28, %29 : vector<2x32xf32>
    %cst_25 = arith.constant 0.000000e+00 : f32
    %31 = vector.broadcast %cst_25 : f32 to vector<2x32xf32>
    %32 = arith.maximumf %30, %31 : vector<2x32xf32>
    %c1_26 = arith.constant 1 : index
    %c0_27 = arith.constant 0 : index
    %c0_28 = arith.constant 0 : index
    %33 = vector.load %arg8[%c1_26, %c0_27, %c0_28] : memref<8x2x32xf32, #tpu.memory_space<vmem>>, vector<1x2x32xf32>
    %34 = vector.shape_cast %33 : vector<1x2x32xf32> to vector<2x32xf32>
    %35 = vector.shape_cast %32 : vector<2x32xf32> to vector<1x2x32xf32>
    tpu.vector_store %arg8[%c1_26, %c0_27, %c0_28], %35 {strides = array<i32>} : memref<8x2x32xf32, #tpu.memory_space<vmem>>, vector<1x2x32xf32>,
    %c2 = arith.constant 2 : index
    %c0_29 = arith.constant 0 : index
    %c0_30 = arith.constant 0 : index
    %36 = vector.load %arg8[%c2, %c0_29, %c0_30] : memref<8x2x32xf32, #tpu.memory_space<vmem>>, vector<1x2x32xf32>
    %37 = vector.shape_cast %36 : vector<1x2x32xf32> to vector<2x32xf32>
    %38 = arith.mulf %15, %32 : vector<2x32xf32>
    %39 = arith.addf %37, %38 : vector<2x32xf32>
    %cst_31 = arith.constant 0.000000e+00 : f32
    %40 = vector.broadcast %cst_31 : f32 to vector<2x32xf32>
    %41 = arith.maximumf %39, %40 : vector<2x32xf32>
    %c2_32 = arith.constant 2 : index
    %c0_33 = arith.constant 0 : index
    %c0_34 = arith.constant 0 : index
    %42 = vector.load %arg8[%c2_32, %c0_33, %c0_34] : memref<8x2x32xf32, #tpu.memory_space<vmem>>, vector<1x2x32xf32>
    %43 = vector.shape_cast %42 : vector<1x2x32xf32> to vector<2x32xf32>
    %44 = vector.shape_cast %41 : vector<2x32xf32> to vector<1x2x32xf32>
    tpu.vector_store %arg8[%c2_32, %c0_33, %c0_34], %44 {strides = array<i32>} : memref<8x2x32xf32, #tpu.memory_space<vmem>>, vector<1x2x32xf32>,
    %c3 = arith.constant 3 : index
    %c0_35 = arith.constant 0 : index
    %c0_36 = arith.constant 0 : index
    %45 = vector.load %arg8[%c3, %c0_35, %c0_36] : memref<8x2x32xf32, #tpu.memory_space<vmem>>, vector<1x2x32xf32>
    %46 = vector.shape_cast %45 : vector<1x2x32xf32> to vector<2x32xf32>
    %47 = arith.mulf %15, %41 : vector<2x32xf32>
    %48 = arith.addf %46, %47 : vector<2x32xf32>
    %cst_37 = arith.constant 0.000000e+00 : f32
    %49 = vector.broadcast %cst_37 : f32 to vector<2x32xf32>
    %50 = arith.maximumf %48, %49 : vector<2x32xf32>
    %c3_38 = arith.constant 3 : index
    %c0_39 = arith.constant 0 : index
    %c0_40 = arith.constant 0 : index
    %51 = vector.load %arg8[%c3_38, %c0_39, %c0_40] : memref<8x2x32xf32, #tpu.memory_space<vmem>>, vector<1x2x32xf32>
    %52 = vector.shape_cast %51 : vector<1x2x32xf32> to vector<2x32xf32>
    %53 = vector.shape_cast %50 : vector<2x32xf32> to vector<1x2x32xf32>
    tpu.vector_store %arg8[%c3_38, %c0_39, %c0_40], %53 {strides = array<i32>} : memref<8x2x32xf32, #tpu.memory_space<vmem>>, vector<1x2x32xf32>,
    %c4 = arith.constant 4 : index
    %c0_41 = arith.constant 0 : index
    %c0_42 = arith.constant 0 : index
    %54 = vector.load %arg8[%c4, %c0_41, %c0_42] : memref<8x2x32xf32, #tpu.memory_space<vmem>>, vector<1x2x32xf32>
    %55 = vector.shape_cast %54 : vector<1x2x32xf32> to vector<2x32xf32>
    %56 = arith.mulf %15, %50 : vector<2x32xf32>
    %57 = arith.addf %55, %56 : vector<2x32xf32>
    %cst_43 = arith.constant 0.000000e+00 : f32
    %58 = vector.broadcast %cst_43 : f32 to vector<2x32xf32>
    %59 = arith.maximumf %57, %58 : vector<2x32xf32>
    %c4_44 = arith.constant 4 : index
    %c0_45 = arith.constant 0 : index
    %c0_46 = arith.constant 0 : index
    %60 = vector.load %arg8[%c4_44, %c0_45, %c0_46] : memref<8x2x32xf32, #tpu.memory_space<vmem>>, vector<1x2x32xf32>
    %61 = vector.shape_cast %60 : vector<1x2x32xf32> to vector<2x32xf32>
    %62 = vector.shape_cast %59 : vector<2x32xf32> to vector<1x2x32xf32>
    tpu.vector_store %arg8[%c4_44, %c0_45, %c0_46], %62 {strides = array<i32>} : memref<8x2x32xf32, #tpu.memory_space<vmem>>, vector<1x2x32xf32>,
    %c5 = arith.constant 5 : index
    %c0_47 = arith.constant 0 : index
    %c0_48 = arith.constant 0 : index
    %63 = vector.load %arg8[%c5, %c0_47, %c0_48] : memref<8x2x32xf32, #tpu.memory_space<vmem>>, vector<1x2x32xf32>
    %64 = vector.shape_cast %63 : vector<1x2x32xf32> to vector<2x32xf32>
    %65 = arith.mulf %15, %59 : vector<2x32xf32>
    %66 = arith.addf %64, %65 : vector<2x32xf32>
    %cst_49 = arith.constant 0.000000e+00 : f32
    %67 = vector.broadcast %cst_49 : f32 to vector<2x32xf32>
    %68 = arith.maximumf %66, %67 : vector<2x32xf32>
    %c5_50 = arith.constant 5 : index
    %c0_51 = arith.constant 0 : index
    %c0_52 = arith.constant 0 : index
    %69 = vector.load %arg8[%c5_50, %c0_51, %c0_52] : memref<8x2x32xf32, #tpu.memory_space<vmem>>, vector<1x2x32xf32>
    %70 = vector.shape_cast %69 : vector<1x2x32xf32> to vector<2x32xf32>
    %71 = vector.shape_cast %68 : vector<2x32xf32> to vector<1x2x32xf32>
    tpu.vector_store %arg8[%c5_50, %c0_51, %c0_52], %71 {strides = array<i32>} : memref<8x2x32xf32, #tpu.memory_space<vmem>>, vector<1x2x32xf32>,
    %c6 = arith.constant 6 : index
    %c0_53 = arith.constant 0 : index
    %c0_54 = arith.constant 0 : index
    %72 = vector.load %arg8[%c6, %c0_53, %c0_54] : memref<8x2x32xf32, #tpu.memory_space<vmem>>, vector<1x2x32xf32>
    %73 = vector.shape_cast %72 : vector<1x2x32xf32> to vector<2x32xf32>
    %74 = arith.mulf %15, %68 : vector<2x32xf32>
    %75 = arith.addf %73, %74 : vector<2x32xf32>
    %cst_55 = arith.constant 0.000000e+00 : f32
    %76 = vector.broadcast %cst_55 : f32 to vector<2x32xf32>
    %77 = arith.maximumf %75, %76 : vector<2x32xf32>
    %c6_56 = arith.constant 6 : index
    %c0_57 = arith.constant 0 : index
    %c0_58 = arith.constant 0 : index
    %78 = vector.load %arg8[%c6_56, %c0_57, %c0_58] : memref<8x2x32xf32, #tpu.memory_space<vmem>>, vector<1x2x32xf32>
    %79 = vector.shape_cast %78 : vector<1x2x32xf32> to vector<2x32xf32>
    %80 = vector.shape_cast %77 : vector<2x32xf32> to vector<1x2x32xf32>
    tpu.vector_store %arg8[%c6_56, %c0_57, %c0_58], %80 {strides = array<i32>} : memref<8x2x32xf32, #tpu.memory_space<vmem>>, vector<1x2x32xf32>,
    %c7 = arith.constant 7 : index
    %c0_59 = arith.constant 0 : index
    %c0_60 = arith.constant 0 : index
    %81 = vector.load %arg8[%c7, %c0_59, %c0_60] : memref<8x2x32xf32, #tpu.memory_space<vmem>>, vector<1x2x32xf32>
    %82 = vector.shape_cast %81 : vector<1x2x32xf32> to vector<2x32xf32>
    %83 = arith.mulf %15, %77 : vector<2x32xf32>
    %84 = arith.addf %82, %83 : vector<2x32xf32>
    %cst_61 = arith.constant 0.000000e+00 : f32
    %85 = vector.broadcast %cst_61 : f32 to vector<2x32xf32>
    %86 = arith.maximumf %84, %85 : vector<2x32xf32>
    %c7_62 = arith.constant 7 : index
    %c0_63 = arith.constant 0 : index
    %c0_64 = arith.constant 0 : index
    %87 = vector.load %arg8[%c7_62, %c0_63, %c0_64] : memref<8x2x32xf32, #tpu.memory_space<vmem>>, vector<1x2x32xf32>
    %88 = vector.shape_cast %87 : vector<1x2x32xf32> to vector<2x32xf32>
    %89 = vector.shape_cast %86 : vector<2x32xf32> to vector<1x2x32xf32>
    tpu.vector_store %arg8[%c7_62, %c0_63, %c0_64], %89 {strides = array<i32>} : memref<8x2x32xf32, #tpu.memory_space<vmem>>, vector<1x2x32xf32>,
    %c0_65 = arith.constant 0 : index
    %c0_66 = arith.constant 0 : index
    %c0_67 = arith.constant 0 : index
    %90 = vector.load %arg7[%c0_65, %c0_66, %c0_67] : memref<2x2x32xf32, #tpu.memory_space<vmem>>, vector<1x2x32xf32>
    %91 = vector.shape_cast %90 : vector<1x2x32xf32> to vector<2x32xf32>
    %92 = vector.shape_cast %86 : vector<2x32xf32> to vector<1x2x32xf32>
    tpu.vector_store %arg7[%c0_65, %c0_66, %c0_67], %92 {strides = array<i32>} : memref<2x2x32xf32, #tpu.memory_space<vmem>>, vector<1x2x32xf32>,
    %c0_68 = arith.constant 0 : index
    %c0_69 = arith.constant 0 : index
    %c0_70 = arith.constant 0 : index
    %93 = vector.load %arg8[%c0_68, %c0_69, %c0_70] : memref<8x2x32xf32, #tpu.memory_space<vmem>>, vector<8x2x32xf32>
    %94 = vector.shape_cast %93 : vector<8x2x32xf32> to vector<16x32xf32>
    %c0_71 = arith.constant 0 : index
    %c0_72 = arith.constant 0 : index
    %c0_73 = arith.constant 0 : index
    %95 = vector.load %arg3[%c0_71, %c0_72, %c0_73] : memref<1x32x32xf32, #tpu.memory_space<vmem>>, vector<1x32x32xf32>
    %96 = vector.shape_cast %95 : vector<1x32x32xf32> to vector<32x32xf32>
    %cst_74 = arith.constant dense<0.000000e+00> : vector<16x32xf32>
    %97 = tpu.matmul %94, %96, %cst_74 {dimension_numbers = #tpu.dot_dimension_numbers<[1], [0], [0], [1], [0, 0, 1, 1], [], []>} : vector<16x32xf32>, vector<32x32xf32>, vector<16x32xf32> -> vector<16x32xf32>
    %c1_75 = arith.constant 1 : index
    %c0_76 = arith.constant 0 : index
    %c0_77 = arith.constant 0 : index
    %98 = vector.load %arg4[%c1_75, %c0_76, %c0_77] : memref<2x1x32xf32, #tpu.memory_space<vmem>>, vector<1x1x32xf32>
    %99 = vector.shape_cast %98 : vector<1x1x32xf32> to vector<1x32xf32>
    %100 = vector.broadcast %99 : vector<1x32xf32> to vector<16x32xf32>
    %101 = arith.addf %97, %100 : vector<16x32xf32>
    %102 = vector.shape_cast %101 : vector<16x32xf32> to vector<8x2x32xf32>
    %c0_78 = arith.constant 0 : index
    %c0_79 = arith.constant 0 : index
    %c0_80 = arith.constant 0 : index
    %103 = vector.load %arg8[%c0_78, %c0_79, %c0_80] : memref<8x2x32xf32, #tpu.memory_space<vmem>>, vector<8x2x32xf32>
    tpu.vector_store %arg8[%c0_78, %c0_79, %c0_80], %102 {strides = array<i32>} : memref<8x2x32xf32, #tpu.memory_space<vmem>>, vector<8x2x32xf32>,
    %c1_81 = arith.constant 1 : index
    %c0_82 = arith.constant 0 : index
    %c0_83 = arith.constant 0 : index
    %104 = vector.load %arg5[%c1_81, %c0_82, %c0_83] : memref<2x1x32xf32, #tpu.memory_space<vmem>>, vector<1x1x32xf32>
    %105 = vector.shape_cast %104 : vector<1x1x32xf32> to vector<1x32xf32>
    %106 = vector.shape_cast %105 : vector<1x32xf32> to vector<1x32xf32>
    %107 = vector.broadcast %106 : vector<1x32xf32> to vector<2x32xf32>
    %c1_84 = arith.constant 1 : index
    %c0_85 = arith.constant 0 : index
    %c0_86 = arith.constant 0 : index
    %108 = vector.load %arg7[%c1_84, %c0_85, %c0_86] : memref<2x2x32xf32, #tpu.memory_space<vmem>>, vector<1x2x32xf32>
    %109 = vector.shape_cast %108 : vector<1x2x32xf32> to vector<2x32xf32>
    %c0_87 = arith.constant 0 : index
    %c0_88 = arith.constant 0 : index
    %c0_89 = arith.constant 0 : index
    %110 = vector.load %arg8[%c0_87, %c0_88, %c0_89] : memref<8x2x32xf32, #tpu.memory_space<vmem>>, vector<1x2x32xf32>
    %111 = vector.shape_cast %110 : vector<1x2x32xf32> to vector<2x32xf32>
    %112 = arith.mulf %107, %109 : vector<2x32xf32>
    %113 = arith.addf %111, %112 : vector<2x32xf32>
    %cst_90 = arith.constant 0.000000e+00 : f32
    %114 = vector.broadcast %cst_90 : f32 to vector<2x32xf32>
    %115 = arith.maximumf %113, %114 : vector<2x32xf32>
    %c0_91 = arith.constant 0 : index
    %c0_92 = arith.constant 0 : index
    %c0_93 = arith.constant 0 : index
    %116 = vector.load %arg8[%c0_91, %c0_92, %c0_93] : memref<8x2x32xf32, #tpu.memory_space<vmem>>, vector<1x2x32xf32>
    %117 = vector.shape_cast %116 : vector<1x2x32xf32> to vector<2x32xf32>
    %118 = vector.shape_cast %115 : vector<2x32xf32> to vector<1x2x32xf32>
    tpu.vector_store %arg8[%c0_91, %c0_92, %c0_93], %118 {strides = array<i32>} : memref<8x2x32xf32, #tpu.memory_space<vmem>>, vector<1x2x32xf32>,
    %c1_94 = arith.constant 1 : index
    %c0_95 = arith.constant 0 : index
    %c0_96 = arith.constant 0 : index
    %119 = vector.load %arg8[%c1_94, %c0_95, %c0_96] : memref<8x2x32xf32, #tpu.memory_space<vmem>>, vector<1x2x32xf32>
    %120 = vector.shape_cast %119 : vector<1x2x32xf32> to vector<2x32xf32>
    %121 = arith.mulf %107, %115 : vector<2x32xf32>
    %122 = arith.addf %120, %121 : vector<2x32xf32>
    %cst_97 = arith.constant 0.000000e+00 : f32
    %123 = vector.broadcast %cst_97 : f32 to vector<2x32xf32>
    %124 = arith.maximumf %122, %123 : vector<2x32xf32>
    %c1_98 = arith.constant 1 : index
    %c0_99 = arith.constant 0 : index
    %c0_100 = arith.constant 0 : index
    %125 = vector.load %arg8[%c1_98, %c0_99, %c0_100] : memref<8x2x32xf32, #tpu.memory_space<vmem>>, vector<1x2x32xf32>
    %126 = vector.shape_cast %125 : vector<1x2x32xf32> to vector<2x32xf32>
    %127 = vector.shape_cast %124 : vector<2x32xf32> to vector<1x2x32xf32>
    tpu.vector_store %arg8[%c1_98, %c0_99, %c0_100], %127 {strides = array<i32>} : memref<8x2x32xf32, #tpu.memory_space<vmem>>, vector<1x2x32xf32>,
    %c2_101 = arith.constant 2 : index
    %c0_102 = arith.constant 0 : index
    %c0_103 = arith.constant 0 : index
    %128 = vector.load %arg8[%c2_101, %c0_102, %c0_103] : memref<8x2x32xf32, #tpu.memory_space<vmem>>, vector<1x2x32xf32>
    %129 = vector.shape_cast %128 : vector<1x2x32xf32> to vector<2x32xf32>
    %130 = arith.mulf %107, %124 : vector<2x32xf32>
    %131 = arith.addf %129, %130 : vector<2x32xf32>
    %cst_104 = arith.constant 0.000000e+00 : f32
    %132 = vector.broadcast %cst_104 : f32 to vector<2x32xf32>
    %133 = arith.maximumf %131, %132 : vector<2x32xf32>
    %c2_105 = arith.constant 2 : index
    %c0_106 = arith.constant 0 : index
    %c0_107 = arith.constant 0 : index
    %134 = vector.load %arg8[%c2_105, %c0_106, %c0_107] : memref<8x2x32xf32, #tpu.memory_space<vmem>>, vector<1x2x32xf32>
    %135 = vector.shape_cast %134 : vector<1x2x32xf32> to vector<2x32xf32>
    %136 = vector.shape_cast %133 : vector<2x32xf32> to vector<1x2x32xf32>
    tpu.vector_store %arg8[%c2_105, %c0_106, %c0_107], %136 {strides = array<i32>} : memref<8x2x32xf32, #tpu.memory_space<vmem>>, vector<1x2x32xf32>,
    %c3_108 = arith.constant 3 : index
    %c0_109 = arith.constant 0 : index
    %c0_110 = arith.constant 0 : index
    %137 = vector.load %arg8[%c3_108, %c0_109, %c0_110] : memref<8x2x32xf32, #tpu.memory_space<vmem>>, vector<1x2x32xf32>
    %138 = vector.shape_cast %137 : vector<1x2x32xf32> to vector<2x32xf32>
    %139 = arith.mulf %107, %133 : vector<2x32xf32>
    %140 = arith.addf %138, %139 : vector<2x32xf32>
    %cst_111 = arith.constant 0.000000e+00 : f32
    %141 = vector.broadcast %cst_111 : f32 to vector<2x32xf32>
    %142 = arith.maximumf %140, %141 : vector<2x32xf32>
    %c3_112 = arith.constant 3 : index
    %c0_113 = arith.constant 0 : index
    %c0_114 = arith.constant 0 : index
    %143 = vector.load %arg8[%c3_112, %c0_113, %c0_114] : memref<8x2x32xf32, #tpu.memory_space<vmem>>, vector<1x2x32xf32>
    %144 = vector.shape_cast %143 : vector<1x2x32xf32> to vector<2x32xf32>
    %145 = vector.shape_cast %142 : vector<2x32xf32> to vector<1x2x32xf32>
    tpu.vector_store %arg8[%c3_112, %c0_113, %c0_114], %145 {strides = array<i32>} : memref<8x2x32xf32, #tpu.memory_space<vmem>>, vector<1x2x32xf32>,
    %c4_115 = arith.constant 4 : index
    %c0_116 = arith.constant 0 : index
    %c0_117 = arith.constant 0 : index
    %146 = vector.load %arg8[%c4_115, %c0_116, %c0_117] : memref<8x2x32xf32, #tpu.memory_space<vmem>>, vector<1x2x32xf32>
    %147 = vector.shape_cast %146 : vector<1x2x32xf32> to vector<2x32xf32>
    %148 = arith.mulf %107, %142 : vector<2x32xf32>
    %149 = arith.addf %147, %148 : vector<2x32xf32>
    %cst_118 = arith.constant 0.000000e+00 : f32
    %150 = vector.broadcast %cst_118 : f32 to vector<2x32xf32>
    %151 = arith.maximumf %149, %150 : vector<2x32xf32>
    %c4_119 = arith.constant 4 : index
    %c0_120 = arith.constant 0 : index
    %c0_121 = arith.constant 0 : index
    %152 = vector.load %arg8[%c4_119, %c0_120, %c0_121] : memref<8x2x32xf32, #tpu.memory_space<vmem>>, vector<1x2x32xf32>
    %153 = vector.shape_cast %152 : vector<1x2x32xf32> to vector<2x32xf32>
    %154 = vector.shape_cast %151 : vector<2x32xf32> to vector<1x2x32xf32>
    tpu.vector_store %arg8[%c4_119, %c0_120, %c0_121], %154 {strides = array<i32>} : memref<8x2x32xf32, #tpu.memory_space<vmem>>, vector<1x2x32xf32>,
    %c5_122 = arith.constant 5 : index
    %c0_123 = arith.constant 0 : index
    %c0_124 = arith.constant 0 : index
    %155 = vector.load %arg8[%c5_122, %c0_123, %c0_124] : memref<8x2x32xf32, #tpu.memory_space<vmem>>, vector<1x2x32xf32>
    %156 = vector.shape_cast %155 : vector<1x2x32xf32> to vector<2x32xf32>
    %157 = arith.mulf %107, %151 : vector<2x32xf32>
    %158 = arith.addf %156, %157 : vector<2x32xf32>
    %cst_125 = arith.constant 0.000000e+00 : f32
    %159 = vector.broadcast %cst_125 : f32 to vector<2x32xf32>
    %160 = arith.maximumf %158, %159 : vector<2x32xf32>
    %c5_126 = arith.constant 5 : index
    %c0_127 = arith.constant 0 : index
    %c0_128 = arith.constant 0 : index
    %161 = vector.load %arg8[%c5_126, %c0_127, %c0_128] : memref<8x2x32xf32, #tpu.memory_space<vmem>>, vector<1x2x32xf32>
    %162 = vector.shape_cast %161 : vector<1x2x32xf32> to vector<2x32xf32>
    %163 = vector.shape_cast %160 : vector<2x32xf32> to vector<1x2x32xf32>
    tpu.vector_store %arg8[%c5_126, %c0_127, %c0_128], %163 {strides = array<i32>} : memref<8x2x32xf32, #tpu.memory_space<vmem>>, vector<1x2x32xf32>,
    %c6_129 = arith.constant 6 : index
    %c0_130 = arith.constant 0 : index
    %c0_131 = arith.constant 0 : index
    %164 = vector.load %arg8[%c6_129, %c0_130, %c0_131] : memref<8x2x32xf32, #tpu.memory_space<vmem>>, vector<1x2x32xf32>
    %165 = vector.shape_cast %164 : vector<1x2x32xf32> to vector<2x32xf32>
    %166 = arith.mulf %107, %160 : vector<2x32xf32>
    %167 = arith.addf %165, %166 : vector<2x32xf32>
    %cst_132 = arith.constant 0.000000e+00 : f32
    %168 = vector.broadcast %cst_132 : f32 to vector<2x32xf32>
    %169 = arith.maximumf %167, %168 : vector<2x32xf32>
    %c6_133 = arith.constant 6 : index
    %c0_134 = arith.constant 0 : index
    %c0_135 = arith.constant 0 : index
    %170 = vector.load %arg8[%c6_133, %c0_134, %c0_135] : memref<8x2x32xf32, #tpu.memory_space<vmem>>, vector<1x2x32xf32>
    %171 = vector.shape_cast %170 : vector<1x2x32xf32> to vector<2x32xf32>
    %172 = vector.shape_cast %169 : vector<2x32xf32> to vector<1x2x32xf32>
    tpu.vector_store %arg8[%c6_133, %c0_134, %c0_135], %172 {strides = array<i32>} : memref<8x2x32xf32, #tpu.memory_space<vmem>>, vector<1x2x32xf32>,
    %c7_136 = arith.constant 7 : index
    %c0_137 = arith.constant 0 : index
    %c0_138 = arith.constant 0 : index
    %173 = vector.load %arg8[%c7_136, %c0_137, %c0_138] : memref<8x2x32xf32, #tpu.memory_space<vmem>>, vector<1x2x32xf32>
    %174 = vector.shape_cast %173 : vector<1x2x32xf32> to vector<2x32xf32>
    %175 = arith.mulf %107, %169 : vector<2x32xf32>
    %176 = arith.addf %174, %175 : vector<2x32xf32>
    %cst_139 = arith.constant 0.000000e+00 : f32
    %177 = vector.broadcast %cst_139 : f32 to vector<2x32xf32>
    %178 = arith.maximumf %176, %177 : vector<2x32xf32>
    %c7_140 = arith.constant 7 : index
    %c0_141 = arith.constant 0 : index
    %c0_142 = arith.constant 0 : index
    %179 = vector.load %arg8[%c7_140, %c0_141, %c0_142] : memref<8x2x32xf32, #tpu.memory_space<vmem>>, vector<1x2x32xf32>
    %180 = vector.shape_cast %179 : vector<1x2x32xf32> to vector<2x32xf32>
    %181 = vector.shape_cast %178 : vector<2x32xf32> to vector<1x2x32xf32>
    tpu.vector_store %arg8[%c7_140, %c0_141, %c0_142], %181 {strides = array<i32>} : memref<8x2x32xf32, #tpu.memory_space<vmem>>, vector<1x2x32xf32>,
    %c1_143 = arith.constant 1 : index
    %c0_144 = arith.constant 0 : index
    %c0_145 = arith.constant 0 : index
    %182 = vector.load %arg7[%c1_143, %c0_144, %c0_145] : memref<2x2x32xf32, #tpu.memory_space<vmem>>, vector<1x2x32xf32>
    %183 = vector.shape_cast %182 : vector<1x2x32xf32> to vector<2x32xf32>
    %184 = vector.shape_cast %178 : vector<2x32xf32> to vector<1x2x32xf32>
    tpu.vector_store %arg7[%c1_143, %c0_144, %c0_145], %184 {strides = array<i32>} : memref<2x2x32xf32, #tpu.memory_space<vmem>>, vector<1x2x32xf32>,
    %c0_146 = arith.constant 0 : index
    %c0_147 = arith.constant 0 : index
    %c0_148 = arith.constant 0 : index
    %185 = vector.load %arg8[%c0_146, %c0_147, %c0_148] : memref<8x2x32xf32, #tpu.memory_space<vmem>>, vector<8x2x32xf32>
    %186 = vector.shape_cast %185 : vector<8x2x32xf32> to vector<16x32xf32>
    %c0_149 = arith.constant 0 : index
    %c0_150 = arith.constant 0 : index
    %187 = vector.load %arg6[%c0_149, %c0_150] : memref<16x32xf32, #tpu.memory_space<vmem>>, vector<16x32xf32>
    tpu.vector_store %arg6[%c0_149, %c0_150], %186 {strides = array<i32>} : memref<16x32xf32, #tpu.memory_space<vmem>>, vector<16x32xf32>,
    return
  }
  func.func @transform_0(%arg0: i32) -> (i32, i32) {
    %c0_i32 = arith.constant 0 : i32
    %c0_i32_0 = arith.constant 0 : i32
    return %arg0, %c0_i32 : i32, i32
  }
  func.func @transform_1(%arg0: i32) -> (i32, i32) {
    %c0_i32 = arith.constant 0 : i32
    %c0_i32_0 = arith.constant 0 : i32
    %c0_i32_1 = arith.constant 0 : i32
    return %c0_i32, %c0_i32_0 : i32, i32
  }
  func.func @transform_2(%arg0: i32) -> (i32, i32, i32) {
    %c0_i32 = arith.constant 0 : i32
    %c0_i32_0 = arith.constant 0 : i32
    %c0_i32_1 = arith.constant 0 : i32
    %c0_i32_2 = arith.constant 0 : i32
    return %c0_i32, %c0_i32_0, %c0_i32_1 : i32, i32, i32
  }
  func.func @transform_3(%arg0: i32) -> (i32, i32, i32) {
    %c0_i32 = arith.constant 0 : i32
    %c0_i32_0 = arith.constant 0 : i32
    %c0_i32_1 = arith.constant 0 : i32
    %c0_i32_2 = arith.constant 0 : i32
    return %c0_i32, %c0_i32_0, %c0_i32_1 : i32, i32, i32
  }
  func.func @transform_4(%arg0: i32) -> (i32, i32, i32) {
    %c0_i32 = arith.constant 0 : i32
    %c0_i32_0 = arith.constant 0 : i32
    %c0_i32_1 = arith.constant 0 : i32
    %c0_i32_2 = arith.constant 0 : i32
    return %c0_i32, %c0_i32_0, %c0_i32_1 : i32, i32, i32
  }
  func.func @transform_5(%arg0: i32) -> (i32, i32) {
    %c0_i32 = arith.constant 0 : i32
    %c0_i32_0 = arith.constant 0 : i32
    return %arg0, %c0_i32 : i32, i32
  }
}

</mosaic_0001>

<bundles_post_ra>
// kernel: tpu_custom_call.1
= control target key start
LH: loop header
LB: loop body
LE: loop exit
PB: predicated region body
PF: predicated region fallthrough
CT: control target
= control target key end

     0   :  { %10 = vsyncpa [#allocation5], 0  ;;  %s806_s0 = inlined_call_operand.vmem [shape: f32[16,4], index: 0, kind: input, shape index: {}]   ;;  %s807_s1 = inlined_call_operand.vmem [shape: f32[4,32], index: 1, kind: input, shape index: {}]   ;;  %s808_s2 = inlined_call_operand.hbm [shape: f32[1,32,32], index: 2, kind: input, shape index: {}]   ;;  %s809_s3 = inlined_call_operand.vmem [shape: f32[2,1,32], index: 3, kind: input, shape index: {}]   ;;  %s810_s4 = inlined_call_operand.vmem [shape: f32[2,1,32], index: 4, kind: input, shape index: {}]   ;;  %s811_s5 = inlined_call_operand.hbm [shape: f32[16,32], index: 5, kind: output, shape index: {}]  }
   0x1   :  { %11 = vsyncpa [#allocation6], 0  ;;  %s661_s18 = smov [#allocation4]   ;;  %s613_s22 = scalar_lea.hbm %s808_s2, 512 }
   0x2   :  { %s21_s19 = sshll.u32 %s661_s18, 4  ;;  %p614_p0 = scmp.ne.s32.totalorder %s808_s2, %s613_s22  ;;  %s22_s19 = int_to_ptr.vmem [resolvable:$true] %s21_s19 }
   0x3   :  { %p617_p1 = scmp.lt.u32.totalorder %s613_s22, %s808_s2 }
   0x5   :  { %p619_p2 = pnand %p617_p1, %p614_p0 }
   0x7   :  { %622 = shalt.err (!%p619_p2)
}
   0x8   :  { %s623_s27 = scalar_lea.vmem %s22_s19, 512  ;;  %p628_p4 = scmp.lt.s32.totalorder %s22_s19, %s22_s19 }
   0x9   :  { %p624_p3 = scmp.ne.s32.totalorder %s22_s19, %s623_s27  ;;  %p629_p5 = scmp.lt.s32.totalorder %s623_s27, %s623_s27 }
   0xb   :  { %p630_p6 = por %p629_p5, %p628_p4 }
   0xd   :  { %p631_p7 = pnand %p630_p6, %p624_p3 }
   0xf   :  { %634 = shalt.err (!%p631_p7)
}
  0x10   :  { %s662_s28 = smov 128   ;;  %s663_s29 = smov 8  }
  0x11   :  { %27 = dma.hbm_to_vmem [thread:$0]  %s808_s2, 512, %s22_s19, [#allocation5], %s662_s28, %s662_s28, %s663_s29  }
  0x12   :  { %657 = dma.done.wait [#allocation5], 512  }
  0x13   :  { %658 = vsyncadd [#allocation5], 4294966784  ;;  %vm59_vm0 = vcmask 1043456   ;;  %vm52_vm1 = vcmask 31744   ;;  %v44_v0 = vld [vmem:[%s807_s1] sm:$0xf]  ;;  %v144_v12 = vlaneseq }
  0x14   :  { %v42_v1 = vld [vmem:[%s806_s0] sm:$0xff]  ;;  %v43_v2 = vld [vmem:[%s806_s0 + $0x8] sm:$0xff]  ;;  %583 = vmatprep.subr.msk.mxu0 %vm59_vm0, %v44_v0  ;;  %vm39_vm2 = vcmask 254976   ;;  %v664_v3 = vmov 0.0   ;;  %v255_v4 = vld [vmem:[#allocation4] sm:$0xff]  ;;  %vm309_vm3 = vcmask 261120  }
  0x15   :  { %585 = vmatprep.mubr.msk.f32.mxu0 %vm52_vm1, %v42_v1  ;;  %584 = vmatpush3.msk.msra.mxu0 %vm59_vm0, %v44_v0  ;;  %40 = vst.msk [vmem:[#allocation2] sm:$0x3] %vm39_vm2, %v664_v3  ;;  %41 = vst.msk [vmem:[#allocation2 + $0x2] sm:$0x3] %vm39_vm2, %v664_v3  ;;  %v256_v5 = vld [vmem:[#allocation4 + $0x8] sm:$0xff]  ;;  %v257_v6 = vld [vmem:[#allocation4 + $0x10] sm:$0xff] }
  0x16   :  { %586 = vmatmul.mubr.msk.f32.vlgmr.msra.gmra.mrb[0].mxu0 %vm52_vm1, %v43_v2  ;;  %v599_v7 = vpack.c.bf16 %v256_v5, %v255_v4  ;;  %v258_v8 = vld [vmem:[#allocation4 + $0x18] sm:$0xff]  ;;  %v665_v10 = vmov 1983009808   ;;  %v145_v14 = vshrl.u32 %v144_v12, 7  ;;  %v563_v15 = vld [vmem:[%s809_s3] ss:$0 sm:$0xff] }
  0x17   :  { %v603_v9 = vpack.c.bf16 %v258_v8, %v257_v6  ;;  %v142_v11 = vunpack.c.l.s4 %v665_v10  ;;  %v567_v30 = vld [vmem:[%s810_s4] ss:$0 sm:$0xff] }
  0x18   :  { %600 = vmatprep.subr.bf16.mxu1 %v599_v7 }
  0x19   :  { %602 = vmatpush3.bf16.msra.mxu1 %v599_v7  ;;  %v143_v13 = vunpack.c.0.s8 %v142_v11 }
  0x1a   :  { %604 = vmatprep.subr.bf16.mxu1 %v603_v9 }
  0x1b   :  { %v726_v16 = vsub.s32 %v143_v13, %v145_v14 }
  0x1c   :  { %v198_v31 = vld [vmem:[#allocation2] sm:$0x3] }
  0x1d   :  { %606 = vmatpush3.bf16.msra.mxu1 %v603_v9  ;;  %v200_v33 = vmul.f32 %v567_v30, %v198_v31 }
  0xe9   :  { %v587_v17 = vpop.f32.mrb[0].mxu0 }
  0xea   :  { %v135_v18 = vadd.f32 %v587_v17, %v563_v15  ;;  %v129_v19 = vpop.f32.mrb[1].mxu0 }
  0xeb   :  { %v130_v20 = vadd.f32 %v563_v15, %v129_v19 }
  0xec   :  { %v157_v21 = vcombine.high %v135_v18, %v135_v18  ;;  %v164_v22 = vrot.slane %v135_v18, %v726_v16 }
  0xed   :  { %v140_v23 = vcombine.high %v130_v20, %v130_v20  ;;  %v147_v24 = vrot.slane %v130_v20, %v726_v16  ;;  %v569_v20 = vld [vmem:[%s809_s3 + $0x1] ss:$0 sm:$0xff] }
  0xee   :  { %v171_v25 = vrot.slane %v157_v21, %v726_v16  ;;  %v172_v26 = vcombine.high %v164_v22, %v164_v22  ;;  %187 = vst.msk [vmem:[#allocation3 + $0x8] sm:$0x3] %vm39_vm2, %v164_v22 }
  0xef   :  { %v154_v27 = vrot.slane %v140_v23, %v726_v16  ;;  %v155_v28 = vcombine.high %v147_v24, %v147_v24  ;;  %183 = vst.msk [vmem:[#allocation3] sm:$0x3] %vm39_vm2, %v147_v24 }
  0xf0   :  { %v173_v29 = vcombine.high %v171_v25, %v171_v25  ;;  %188 = vst.msk [vmem:[#allocation3 + $0xa] sm:$0x3] %vm39_vm2, %v172_v26  ;;  %189 = vst.msk [vmem:[#allocation3 + $0xc] sm:$0x3] %vm39_vm2, %v171_v25 }
  0xf1   :  { %v156_v32 = vcombine.high %v154_v27, %v154_v27  ;;  %184 = vst.msk [vmem:[#allocation3 + $0x2] sm:$0x3] %vm39_vm2, %v155_v28  ;;  %185 = vst.msk [vmem:[#allocation3 + $0x4] sm:$0x3] %vm39_vm2, %v154_v27 }
  0xf2   :  { %190 = vst.msk [vmem:[#allocation3 + $0xe] sm:$0x3] %vm39_vm2, %v173_v29 }
  0xf3   :  { %186 = vst.msk [vmem:[#allocation3 + $0x6] sm:$0x3] %vm39_vm2, %v156_v32 }
  0xf5   :  { %v223_v50 = vld [vmem:[#allocation3 + $0x8] sm:$0x3] }
  0xf6   :  { %v199_v34 = vld [vmem:[#allocation3] sm:$0x3] }
  0xf7   :  { %v201_v35 = vadd.f32 %v200_v33, %v199_v34  ;;  %v229_v57 = vld [vmem:[#allocation3 + $0xa] sm:$0x3]  ;;  %v235_v3 = vld [vmem:[#allocation3 + $0xc] sm:$0x3]  ;;  %v573_v34 = vld [vmem:[%s810_s4 + $0x1] ss:$0 sm:$0xff] }
  0xf8   :  { %v205_v38 = vld [vmem:[#allocation3 + $0x2] sm:$0x3]  ;;  %v211_v42 = vld [vmem:[#allocation3 + $0x4] sm:$0x3]  ;;  %s666_s4 = smov [#allocation7]  }
  0xf9   :  { %v202_v36 = vmax.f32 %v201_v35, 0.0  ;;  %v241_v7 = vld [vmem:[#allocation3 + $0xe] sm:$0x3]  ;;  %v450_v35 = vld [vmem:[#allocation2 + $0x2] sm:$0x3]  ;;  %s551_s17 = sshll.u32 %s666_s4, 4  ;;  %s552_s17 = int_to_ptr.vmem [resolvable:$true] %s551_s17 }
  0xfa   :  { %v217_v46 = vld [vmem:[#allocation3 + $0x6] sm:$0x3]  ;;  %s635_s18 = scalar_lea.vmem %s552_s17, 256  ;;  %p640_p9 = scmp.lt.s32.totalorder %s552_s17, %s552_s17 }
  0xfb   :  { %203 = vst.msk [vmem:[#allocation3] sm:$0x3] %vm39_vm2, %v202_v36  ;;  %v206_v37 = vmul.f32 %v567_v30, %v202_v36  ;;  %p636_p8 = scmp.ne.s32.totalorder %s552_s17, %s635_s18  ;;  %p641_p10 = scmp.lt.s32.totalorder %s635_s18, %s635_s18 }
  0xfd   :  { %v207_v39 = vadd.f32 %v206_v37, %v205_v38  ;;  %v452_v37 = vmul.f32 %v573_v34, %v450_v35  ;;  %p642_p11 = por %p641_p10, %p640_p9 }
  0xff   :  { %v208_v40 = vmax.f32 %v207_v39, 0.0  ;;  %p643_p12 = pnand %p642_p11, %p636_p8 }
 0x101   :  { %209 = vst.msk [vmem:[#allocation3 + $0x2] sm:$0x3] %vm39_vm2, %v208_v40  ;;  %v212_v41 = vmul.f32 %v567_v30, %v208_v40 }
 0x102   :  { %v247_v54 = vld [vmem:[#allocation3] sm:$0x3] }
 0x103   :  { %v213_v43 = vadd.f32 %v212_v41, %v211_v42 }
 0x105   :  { %v214_v44 = vmax.f32 %v213_v43, 0.0 }
 0x107   :  { %215 = vst.msk [vmem:[#allocation3 + $0x4] sm:$0x3] %vm39_vm2, %v214_v44  ;;  %v218_v45 = vmul.f32 %v567_v30, %v214_v44 }
 0x108   :  { %v248_v52 = vld [vmem:[#allocation3 + $0x2] sm:$0x3] }
 0x109   :  { %v219_v47 = vadd.f32 %v218_v45, %v217_v46  ;;  %v275_v56 = vcombine.low %v247_v54, %v248_v52 }
 0x10b   :  { %v220_v48 = vmax.f32 %v219_v47, 0.0  ;;  %v283_v63 = vrot.slane %v275_v56, %v726_v16 }
 0x10d   :  { %221 = vst.msk [vmem:[#allocation3 + $0x6] sm:$0x3] %vm39_vm2, %v220_v48  ;;  %v224_v49 = vmul.f32 %v567_v30, %v220_v48 }
 0x10e   :  { %v249_v58 = vld [vmem:[#allocation3 + $0x4] sm:$0x3] }
 0x10f   :  { %v225_v51 = vadd.f32 %v224_v49, %v223_v50 }
 0x111   :  { %v226_v53 = vmax.f32 %v225_v51, 0.0 }
 0x113   :  { %227 = vst.msk [vmem:[#allocation3 + $0x8] sm:$0x3] %vm39_vm2, %v226_v53  ;;  %v230_v55 = vmul.f32 %v567_v30, %v226_v53 }
 0x114   :  { %v250_v59 = vld [vmem:[#allocation3 + $0x6] sm:$0x3] }
 0x115   :  { %v231_v60 = vadd.f32 %v230_v55, %v229_v57  ;;  %v276_v61 = vcombine.low %v249_v58, %v250_v59 }
 0x117   :  { %v232_v62 = vmax.f32 %v231_v60, 0.0  ;;  %v290_v0 = vrot.slane %v276_v61, %v726_v16 }
 0x119   :  { %v236_v1 = vmul.f32 %v567_v30, %v232_v62  ;;  %233 = vst.msk [vmem:[#allocation3 + $0xa] sm:$0x3] %vm39_vm2, %v232_v62  ;;  %v291_v2 = vcombine.low %v283_v63, %v290_v0 }
 0x11a   :  { %v251_v11 = vld [vmem:[#allocation3 + $0x8] sm:$0x3] }
 0x11b   :  { %v237_v4 = vadd.f32 %v236_v1, %v235_v3  ;;  %596 = vmatprep.mubr.msk.f32.mxu1 %vm309_vm3, %v291_v2 }
 0x11d   :  { %v238_v5 = vmax.f32 %v237_v4, 0.0 }
 0x11f   :  { %v242_v6 = vmul.f32 %v567_v30, %v238_v5  ;;  %239 = vst.msk [vmem:[#allocation3 + $0xc] sm:$0x3] %vm39_vm2, %v238_v5 }
 0x120   :  { %v252_v10 = vld [vmem:[#allocation3 + $0xa] sm:$0x3] }
 0x121   :  { %v243_v8 = vadd.f32 %v242_v6, %v241_v7  ;;  %v292_v12 = vcombine.low %v251_v11, %v252_v10 }
 0x123   :  { %v244_v9 = vmax.f32 %v243_v8, 0.0  ;;  %v300_v17 = vrot.slane %v292_v12, %v726_v16 }
 0x125   :  { %246 = vst.msk [vmem:[#allocation2] sm:$0x3] %vm39_vm2, %v244_v9  ;;  %245 = vst.msk [vmem:[#allocation3 + $0xe] sm:$0x3] %vm39_vm2, %v244_v9 }
 0x126   :  { %v253_v13 = vld [vmem:[#allocation3 + $0xc] sm:$0x3] }
 0x12c   :  { %v254_v14 = vld [vmem:[#allocation3 + $0xe] sm:$0x3] }
 0x12d   :  { %v293_v15 = vcombine.low %v253_v13, %v254_v14 }
 0x12f   :  { %v307_v18 = vrot.slane %v293_v15, %v726_v16 }
 0x131   :  { %v308_v19 = vcombine.low %v300_v17, %v307_v18 }
 0x133   :  { %597 = vmatmul.mubr.msk.f32.vlgmr.msra.gmra.mrb[0].mxu1 %vm309_vm3, %v308_v19 }
 0x206   :  { %v598_v21 = vpop.f32.mrb[0].mxu1 }
 0x207   :  { %v386_v22 = vadd.f32 %v598_v21, %v569_v20  ;;  %v380_v23 = vpop.f32.mrb[1].mxu1 }
 0x208   :  { %v381_v24 = vadd.f32 %v569_v20, %v380_v23 }
 0x209   :  { %v408_v25 = vcombine.high %v386_v22, %v386_v22  ;;  %v415_v26 = vrot.slane %v386_v22, %v726_v16 }
 0x20a   :  { %v391_v27 = vcombine.high %v381_v24, %v381_v24  ;;  %v398_v28 = vrot.slane %v381_v24, %v726_v16 }
 0x20b   :  { %v422_v29 = vrot.slane %v408_v25, %v726_v16  ;;  %v423_v30 = vcombine.high %v415_v26, %v415_v26  ;;  %437 = vst.msk [vmem:[#allocation3 + $0x8] sm:$0x3] %vm39_vm2, %v415_v26 }
 0x20c   :  { %v405_v31 = vrot.slane %v391_v27, %v726_v16  ;;  %v406_v32 = vcombine.high %v398_v28, %v398_v28  ;;  %433 = vst.msk [vmem:[#allocation3] sm:$0x3] %vm39_vm2, %v398_v28 }
 0x20d   :  { %v424_v33 = vcombine.high %v422_v29, %v422_v29  ;;  %438 = vst.msk [vmem:[#allocation3 + $0xa] sm:$0x3] %vm39_vm2, %v423_v30  ;;  %439 = vst.msk [vmem:[#allocation3 + $0xc] sm:$0x3] %vm39_vm2, %v422_v29 }
 0x20e   :  { %v407_v36 = vcombine.high %v405_v31, %v405_v31  ;;  %434 = vst.msk [vmem:[#allocation3 + $0x2] sm:$0x3] %vm39_vm2, %v406_v32  ;;  %435 = vst.msk [vmem:[#allocation3 + $0x4] sm:$0x3] %vm39_vm2, %v405_v31 }
 0x20f   :  { %440 = vst.msk [vmem:[#allocation3 + $0xe] sm:$0x3] %vm39_vm2, %v424_v33 }
 0x210   :  { %436 = vst.msk [vmem:[#allocation3 + $0x6] sm:$0x3] %vm39_vm2, %v407_v36 }
 0x212   :  { %v471_v54 = vld [vmem:[#allocation3 + $0x8] sm:$0x3] }
 0x213   :  { %v451_v38 = vld [vmem:[#allocation3] sm:$0x3] }
 0x214   :  { %v453_v39 = vadd.f32 %v452_v37, %v451_v38  ;;  %v476_v61 = vld [vmem:[#allocation3 + $0xa] sm:$0x3]  ;;  %v481_v7 = vld [vmem:[#allocation3 + $0xc] sm:$0x3] }
 0x215   :  { %v456_v42 = vld [vmem:[#allocation3 + $0x2] sm:$0x3]  ;;  %v461_v46 = vld [vmem:[#allocation3 + $0x4] sm:$0x3] }
 0x216   :  { %v454_v40 = vmax.f32 %v453_v39, 0.0  ;;  %v486_v11 = vld [vmem:[#allocation3 + $0xe] sm:$0x3] }
 0x217   :  { %v466_v50 = vld [vmem:[#allocation3 + $0x6] sm:$0x3] }
 0x218   :  { %455 = vst.msk [vmem:[#allocation3] sm:$0x3] %vm39_vm2, %v454_v40  ;;  %v457_v41 = vmul.f32 %v573_v34, %v454_v40 }
 0x21a   :  { %v458_v43 = vadd.f32 %v457_v41, %v456_v42 }
 0x21c   :  { %v459_v44 = vmax.f32 %v458_v43, 0.0 }
 0x21e   :  { %460 = vst.msk [vmem:[#allocation3 + $0x2] sm:$0x3] %vm39_vm2, %v459_v44  ;;  %v462_v45 = vmul.f32 %v573_v34, %v459_v44 }
 0x21f   :  { %v492_v58 = vld [vmem:[#allocation3] sm:$0x3] }
 0x220   :  { %v463_v47 = vadd.f32 %v462_v45, %v461_v46 }
 0x222   :  { %v464_v48 = vmax.f32 %v463_v47, 0.0 }
 0x224   :  { %465 = vst.msk [vmem:[#allocation3 + $0x4] sm:$0x3] %vm39_vm2, %v464_v48  ;;  %v467_v49 = vmul.f32 %v573_v34, %v464_v48 }
 0x225   :  { %v493_v56 = vld [vmem:[#allocation3 + $0x2] sm:$0x3] }
 0x226   :  { %v468_v51 = vadd.f32 %v467_v49, %v466_v50  ;;  %v508_v60 = vcombine.low %v492_v58, %v493_v56 }
 0x228   :  { %v469_v52 = vmax.f32 %v468_v51, 0.0  ;;  %v516_v3 = vrot.slane %v508_v60, %v726_v16 }
 0x22a   :  { %470 = vst.msk [vmem:[#allocation3 + $0x6] sm:$0x3] %vm39_vm2, %v469_v52  ;;  %v472_v53 = vmul.f32 %v573_v34, %v469_v52 }
 0x22b   :  { %v494_v62 = vld [vmem:[#allocation3 + $0x4] sm:$0x3] }
 0x22c   :  { %v473_v55 = vadd.f32 %v472_v53, %v471_v54 }
 0x22e   :  { %v474_v57 = vmax.f32 %v473_v55, 0.0 }
 0x230   :  { %v477_v59 = vmul.f32 %v573_v34, %v474_v57  ;;  %475 = vst.msk [vmem:[#allocation3 + $0x8] sm:$0x3] %vm39_vm2, %v474_v57 }
 0x231   :  { %v495_v63 = vld [vmem:[#allocation3 + $0x6] sm:$0x3] }
 0x232   :  { %v478_v0 = vadd.f32 %v477_v59, %v476_v61  ;;  %v509_v1 = vcombine.low %v494_v62, %v495_v63 }
 0x234   :  { %v479_v2 = vmax.f32 %v478_v0, 0.0  ;;  %v523_v4 = vrot.slane %v509_v1, %v726_v16 }
 0x236   :  { %v482_v5 = vmul.f32 %v573_v34, %v479_v2  ;;  %480 = vst.msk [vmem:[#allocation3 + $0xa] sm:$0x3] %vm39_vm2, %v479_v2  ;;  %v524_v6 = vcombine.low %v516_v3, %v523_v4 }
 0x237   :  { %v496_v15 = vld [vmem:[#allocation3 + $0x8] sm:$0x3] }
 0x238   :  { %v483_v8 = vadd.f32 %v482_v5, %v481_v7  ;;  %544 = vst.msk [vmem:[#allocation7] sm:$0xff] %vm309_vm3, %v524_v6 }
 0x23a   :  { %v484_v9 = vmax.f32 %v483_v8, 0.0 }
 0x23c   :  { %v487_v10 = vmul.f32 %v573_v34, %v484_v9  ;;  %485 = vst.msk [vmem:[#allocation3 + $0xc] sm:$0x3] %vm39_vm2, %v484_v9 }
 0x23d   :  { %v497_v14 = vld [vmem:[#allocation3 + $0xa] sm:$0x3] }
 0x23e   :  { %v488_v12 = vadd.f32 %v487_v10, %v486_v11  ;;  %v525_v17 = vcombine.low %v496_v15, %v497_v14 }
 0x240   :  { %v489_v13 = vmax.f32 %v488_v12, 0.0  ;;  %v533_v21 = vrot.slane %v525_v17, %v726_v16 }
 0x242   :  { %491 = vst.msk [vmem:[#allocation2 + $0x2] sm:$0x3] %vm39_vm2, %v489_v13  ;;  %490 = vst.msk [vmem:[#allocation3 + $0xe] sm:$0x3] %vm39_vm2, %v489_v13 }
 0x243   :  { %v498_v18 = vld [vmem:[#allocation3 + $0xc] sm:$0x3] }
 0x249   :  { %v499_v19 = vld [vmem:[#allocation3 + $0xe] sm:$0x3] }
 0x24a   :  { %v526_v20 = vcombine.low %v498_v18, %v499_v19 }
 0x24c   :  { %v540_v22 = vrot.slane %v526_v20, %v726_v16 }
 0x24e   :  { %v541_v23 = vcombine.low %v533_v21, %v540_v22 }
 0x250   :  { %545 = vst.msk [vmem:[#allocation7 + $0x8] sm:$0xff] %vm309_vm3, %v541_v23 }
 0x251   :  { %646 = shalt.err (!%p643_p12)
}
 0x252   :  { %s647_s21 = scalar_lea.hbm %s811_s5, 256 }
 0x253   :  { %p648_p13 = scmp.ne.s32.totalorder %s811_s5, %s647_s21  ;;  %p651_p0 = scmp.lt.u32.totalorder %s647_s21, %s811_s5 }
 0x255   :  { %p653_p1 = pnand %p651_p0, %p648_p13 }
 0x257   :  { %656 = shalt.err (!%p653_p1)
}
 0x258   :  { %557 = dma.vmem_to_hbm [thread:$0]  %s552_s17, 256, %s811_s5, [#allocation6], %s662_s28, %s662_s28, %s663_s29  }
 0x259   :  { %659 = dma.done.wait [#allocation6], 256  }
 0x25a   :  { %660 = vsyncadd [#allocation6], 4294967040 }
 0x25b   :  { %561 = vsyncpa [#allocation5], 1 }
 0x25c   :  { %562 = vsyncpa [#allocation6], 1 }

</bundles_post_ra>
